<compile_context>
chip_gen: v5e
topology: v5e:2x2
jax: 0.10.0
libtpu: 0.0.40
codegen_flags: <defaults>
</compile_context>

<pallas_src>
import functools

import jax
import jax.numpy as jnp
from jax.experimental import pallas as pl
from jax.experimental.pallas import tpu as pltpu


def _round_up(x, m):
    return ((x + m - 1) // m) * m


def _patch_embed_kernel(x_ref, w_ref, b_ref, o_ref):
    # x_ref: (tm, K)   bf16 flattened patches (streams with the M grid)
    # w_ref: (K, Np)   bf16 flattened conv weight (grid-invariant, resident)
    # b_ref: (1, Np)   f32 bias (grid-invariant, resident)
    # o_ref: (tm, Np)  output tile, caller dtype (lane-dense: Np % 128 == 0)
    acc = jnp.dot(x_ref[...], w_ref[...], preferred_element_type=jnp.float32)
    o_ref[...] = (acc + b_ref[...]).astype(o_ref.dtype)


def _choose_tm(M, tm_default):
    """Pick the M tile: big for amortization, >=2 blocks for v7x megacore."""
    if M <= 128:
        # Tiny problem: one block equal to the full M extent (a full-extent
        # block is always a legal block shape, regardless of alignment).
        return M
    # Guarantee >= 2 grid blocks (megacore sharding on v7x) while keeping
    # >= 128 rows per block (MXU fill on v5e) and a multiple of 16 rows
    # (bf16 sublane packing).
    tm = min(tm_default, max(128, _round_up(pl.cdiv(M, 2), 128)))
    return _round_up(tm, 16)


def patch_embed_matmul(patches, w, b, out_dtype, *, tm=512):
    """patches: (M, K) bf16-castable, w: (K, N), b: (N,) -> (M, N) out_dtype.

    Pads only the small weight/bias along N up to a multiple of 128
    (lane-dense stores, full MXU N).  M is handled with a ragged last grid
    block (masked stores) -- no pad/copy of the streaming activations.
    The matmul runs in bf16 on the MXU with f32 accumulation + f32 bias.
    """
    M, K = patches.shape
    _, N = w.shape

    Np = _round_up(N, 128)
    tm = _choose_tm(M, tm)
    grid_m = pl.cdiv(M, tm)          # ragged last block -> masked stores

    if Np != N:
        w = jnp.pad(w, ((0, 0), (0, Np - N)))
        b = jnp.pad(b, (0, Np - N))

    if patches.dtype != jnp.bfloat16:
        patches = patches.astype(jnp.bfloat16)
    w_bf = w.astype(jnp.bfloat16)
    b2 = b.reshape(1, Np).astype(jnp.float32)

    out_bytes = jnp.dtype(out_dtype).itemsize
    cost = pl.CostEstimate(
        flops=2 * M * K * Np,
        transcendentals=0,
        bytes_accessed=M * K * 2 + K * Np * 2 + Np * 4 + M * Np * out_bytes,
    )

    out = pl.pallas_call(
        _patch_embed_kernel,
        out_shape=jax.ShapeDtypeStruct((M, Np), out_dtype),
        grid_spec=pltpu.PrefetchScalarGridSpec(
            num_scalar_prefetch=0,
            grid=(grid_m,),
            in_specs=[
                # Streaming patches tile (default depth-2 pipelining).
                pl.BlockSpec((tm, K), lambda i: (i, 0)),
                # Grid-invariant weight / bias: single-buffered residents.
                pl.BlockSpec((K, Np), lambda i: (0, 0),
                             pipeline_mode=pl.Buffered(1)),
                pl.BlockSpec((1, Np), lambda i: (0, 0),
                             pipeline_mode=pl.Buffered(1)),
            ],
            out_specs=pl.BlockSpec((tm, Np), lambda i: (i, 0)),
        ),
        compiler_params=pltpu.CompilerParams(
            # M axis is embarrassingly parallel -> megacore sharding on v7x.
            dimension_semantics=("parallel",),
            # Let XLA fold the im2col transpose/reshape (+ bf16 cast)
            # producer into the patches input DMA instead of an HBM copy.
            allow_input_fusion=[True, False, False],
        ),
        cost_estimate=cost,
    )(patches, w_bf, b2)

    return out if Np == N else out[:, :N]


def patch_embed_forward(x, conv_w, conv_b, *, patch_size, flatten=True):
    """x: (B, C, H, W) NCHW. conv_w: (E, C, P, P) (PyTorch conv layout).
    Returns (B, num_patches, E) if flatten else (B, E, Gh, Gw)."""
    B, C, H, W = x.shape
    P = patch_size
    E = conv_w.shape[0]
    Gh, Gw = H // P, W // P
    out_dtype = x.dtype

    # Cast to bf16 *before* im2col: if the 6-D transpose does not fuse into
    # the kernel's input DMA, the materialized copy is half-size; if it does
    # fuse, the producer chain is still cheaper.
    xb = x.astype(jnp.bfloat16)

    # im2col: non-overlapping patches, flattened in (C, kh, kw) order to match
    # the conv's reduction order.  Pure layout plumbing.
    xp = xb.reshape(B, C, Gh, P, Gw, P)
    xp = jnp.transpose(xp, (0, 2, 4, 1, 3, 5))          # (B, Gh, Gw, C, P, P)
    patches = xp.reshape(B * Gh * Gw, C * P * P)        # (M, K)

    w2 = conv_w.reshape(E, C * P * P).T                 # (K, E)

    out = patch_embed_matmul(patches, w2, conv_b, out_dtype)   # (M, E)

    if flatten:
        # == conv -> flatten(2) -> transpose(1, 2); norm is Identity.
        return out.reshape(B, Gh * Gw, E)
    else:
        return jnp.transpose(out.reshape(B, Gh, Gw, E), (0, 3, 1, 2))


if __name__ == "__main__":
    # Small shapes consistent with the module: img_size=16, patch_size=8,
    # in_chans=4, embed_dim=32 -> grid 2x2, 4 patches per image.
    B, C, H, W = 2, 4, 16, 16
    P = 8
    E = 32

    key = jax.random.PRNGKey(0)
    kx, kw, kb = jax.random.split(key, 3)
    x = jax.random.normal(kx, (B, C, H, W), dtype=jnp.float32)
    conv_w = jax.random.normal(kw, (E, C, P, P), dtype=jnp.float32) * 0.02
    conv_b = jax.random.normal(kb, (E,), dtype=jnp.float32) * 0.02

    fwd = jax.jit(functools.partial(patch_embed_forward, patch_size=P, flatten=True))
    out = fwd(x, conv_w, conv_b)
    jax.block_until_ready(out)

    # Reference check against lax conv (same semantics as nn.Conv2d stride=kernel).
    ref = jax.lax.conv_general_dilated(
        x, conv_w, window_strides=(P, P), padding="VALID",
        dimension_numbers=("NCHW", "OIHW", "NCHW"))
    ref = ref + conv_b[None, :, None, None]
    ref = ref.reshape(B, E, -1).transpose(0, 2, 1)
    assert out.shape == (B, (H // P) * (W // P), E)
    # bf16 matmul inputs (f32 accumulation) -> loosened tolerance.
    err = float(jnp.max(jnp.abs(out - ref)))
    assert jnp.allclose(out, ref, atol=2e-2, rtol=2e-2), err

    print("KERNEL_OK")
</pallas_src>

<mosaic_0001>
module attributes {stable_mosaic.version = 11 : i64} {
  func.func @_patch_embed_kernel(%arg0: i32, %arg1: memref<8x256xbf16, #tpu.memory_space<vmem>>, %arg2: memref<256x128xbf16, #tpu.memory_space<vmem>>, %arg3: memref<1x128xf32, #tpu.memory_space<vmem>>, %arg4: memref<8x128xf32, #tpu.memory_space<vmem>>) attributes {dimension_semantics = [#tpu.dimension_semantics<parallel>], iteration_bounds = array<i64: 1>, scalar_prefetch = 0 : i64, scratch_operands = 0 : i64, tpu.core_type = #tpu.core_type<tc>, window_params = [{transform_indices = @transform_0, window_bounds = array<i64: 8, 256>}, {pipeline_mode = #tpu.pipeline_mode<synchronous>, transform_indices = @transform_1, window_bounds = array<i64: 256, 128>}, {pipeline_mode = #tpu.pipeline_mode<synchronous>, transform_indices = @transform_2, window_bounds = array<i64: 1, 128>}, {transform_indices = @transform_3, window_bounds = array<i64: 8, 128>}]} {
    %c0 = arith.constant 0 : index
    %c0_0 = arith.constant 0 : index
    %0 = vector.load %arg1[%c0, %c0_0] : memref<8x256xbf16, #tpu.memory_space<vmem>>, vector<8x256xbf16>
    %c0_1 = arith.constant 0 : index
    %c0_2 = arith.constant 0 : index
    %1 = vector.load %arg2[%c0_1, %c0_2] : memref<256x128xbf16, #tpu.memory_space<vmem>>, vector<256x128xbf16>
    %cst = arith.constant dense<0.000000e+00> : vector<8x128xf32>
    %2 = tpu.matmul %0, %1, %cst {dimension_numbers = #tpu.dot_dimension_numbers<[1], [0], [0], [1], [0, 0, 1, 1], [], []>} : vector<8x256xbf16>, vector<256x128xbf16>, vector<8x128xf32> -> vector<8x128xf32>
    %c0_3 = arith.constant 0 : index
    %c0_4 = arith.constant 0 : index
    %3 = vector.load %arg3[%c0_3, %c0_4] : memref<1x128xf32, #tpu.memory_space<vmem>>, vector<1x128xf32>
    %4 = vector.broadcast %3 : vector<1x128xf32> to vector<8x128xf32>
    %5 = arith.addf %2, %4 : vector<8x128xf32>
    %c0_5 = arith.constant 0 : index
    %c0_6 = arith.constant 0 : index
    %6 = vector.load %arg4[%c0_5, %c0_6] : memref<8x128xf32, #tpu.memory_space<vmem>>, vector<8x128xf32>
    tpu.vector_store %arg4[%c0_5, %c0_6], %5 {strides = array<i32>} : memref<8x128xf32, #tpu.memory_space<vmem>>, vector<8x128xf32>,
    return
  }
  func.func @transform_0(%arg0: i32) -> (i32, i32) {
    %c0_i32 = arith.constant 0 : i32
    %c0_i32_0 = arith.constant 0 : i32
    return %arg0, %c0_i32 : i32, i32
  }
  func.func @transform_1(%arg0: i32) -> (i32, i32) {
    %c0_i32 = arith.constant 0 : i32
    %c0_i32_0 = arith.constant 0 : i32
    %c0_i32_1 = arith.constant 0 : i32
    return %c0_i32, %c0_i32_0 : i32, i32
  }
  func.func @transform_2(%arg0: i32) -> (i32, i32) {
    %c0_i32 = arith.constant 0 : i32
    %c0_i32_0 = arith.constant 0 : i32
    %c0_i32_1 = arith.constant 0 : i32
    return %c0_i32, %c0_i32_0 : i32, i32
  }
  func.func @transform_3(%arg0: i32) -> (i32, i32) {
    %c0_i32 = arith.constant 0 : i32
    %c0_i32_0 = arith.constant 0 : i32
    return %arg0, %c0_i32 : i32, i32
  }
}

</mosaic_0001>

<bundles_post_ra>
// kernel: patch_embed_forward.1
= control target key start
LH: loop header
LB: loop body
LE: loop exit
PB: predicated region body
PF: predicated region fallthrough
CT: control target
= control target key end

     0   :  { %s384_s0 = inlined_call_operand.vmem [shape: bf16[8,256], index: 0, kind: input, shape index: {}]   ;;  %s385_s1 = inlined_call_operand.vmem [shape: bf16[256,128], index: 1, kind: input, shape index: {}]   ;;  %s386_s2 = inlined_call_operand.vmem [shape: f32[1,128], index: 2, kind: input, shape index: {}]   ;;  %s387_s3 = inlined_call_operand.hbm [shape: f32[8,128], index: 3, kind: output, shape index: {}]  }
   0x1   :  { %v269_v0 = vld [vmem:[%s385_s1 + $0x38] sm:$0xff]  ;;  %v268_v2 = vld [vmem:[%s385_s1 + $0x30] sm:$0xff]  ;;  %v267_v4 = vld [vmem:[%s385_s1 + $0x28] sm:$0xff] }
   0x2   :  { %v277_v1 = vld [vmem:[%s385_s1 + $0x78] sm:$0xff]  ;;  %155 = vmatpush.bf16.msra.mxu0 %v269_v0  ;;  %v276_v3 = vld [vmem:[%s385_s1 + $0x70] sm:$0xff]  ;;  %v275_v5 = vld [vmem:[%s385_s1 + $0x68] sm:$0xff] }
   0x3   :  { %168 = vmatpush.bf16.msra.mxu1 %v277_v1 }
   0x6   :  { %156 = vmatpush.bf16.msra.mxu0 %v268_v2 }
   0x7   :  { %169 = vmatpush.bf16.msra.mxu1 %v276_v3 }
   0x8   :  { %8 = vsyncpa [#allocation3], 0  ;;  %v266_v6 = vld [vmem:[%s385_s1 + $0x20] sm:$0xff]  ;;  %v265_v8 = vld [vmem:[%s385_s1 + $0x18] sm:$0xff]  ;;  %s306_s20 = smov [#allocation2]   ;;  %s189_s24 = sshll.u32 %s387_s3, 4  ;;  %s190_s24 = int_to_ptr.hbm [resolvable:$true] %s189_s24 }
   0x9   :  { %v274_v7 = vld [vmem:[%s385_s1 + $0x60] sm:$0xff]  ;;  %v273_v9 = vld [vmem:[%s385_s1 + $0x58] sm:$0xff]  ;;  %v264_v10 = vld [vmem:[%s385_s1 + $0x10] sm:$0xff]  ;;  %s187_s21 = sshll.u32 %s306_s20, 4  ;;  %s188_s21 = int_to_ptr.vmem [resolvable:$true] %s187_s21 }
   0xa   :  { %157 = vmatpush.bf16.msra.mxu0 %v267_v4  ;;  %v272_v11 = vld [vmem:[%s385_s1 + $0x50] sm:$0xff]  ;;  %v263_v12 = vld [vmem:[%s385_s1 + $0x8] sm:$0xff]  ;;  %v15_v14 = vld [vmem:[%s384_s0] sm:$0xff] }
   0xb   :  { %170 = vmatpush.bf16.msra.mxu1 %v275_v5  ;;  %v271_v13 = vld [vmem:[%s385_s1 + $0x48] sm:$0xff]  ;;  %v53_v15 = vunpack.c.l.b16 %v15_v14  ;;  %v54_v16 = vunpack.c.h.b16 %v15_v14  ;;  %v262_v17 = vld [vmem:[%s385_s1] sm:$0xff] }
   0xc   :  { %v270_v18 = vld [vmem:[%s385_s1 + $0x40] sm:$0xff] }
   0xd   :  { %v55_v19 = vpack.c.b16 %v53_v15, %v53_v15  ;;  %v56_v20 = vpack.c.b16 %v54_v16, %v54_v16  ;;  %v279_v21 = vld [vmem:[%s386_s2] ss:$0 sm:$0xff] }
   0xe   :  { %158 = vmatpush.bf16.msra.mxu0 %v266_v6 }
   0xf   :  { %171 = vmatpush.bf16.msra.mxu1 %v274_v7 }
  0x12   :  { %159 = vmatpush.bf16.msra.mxu0 %v265_v8 }
  0x13   :  { %172 = vmatpush.bf16.msra.mxu1 %v273_v9 }
  0x16   :  { %160 = vmatpush.bf16.msra.mxu0 %v264_v10 }
  0x17   :  { %173 = vmatpush.bf16.msra.mxu1 %v272_v11 }
  0x1a   :  { %161 = vmatpush.bf16.msra.mxu0 %v263_v12 }
  0x1b   :  { %174 = vmatpush.bf16.msra.mxu1 %v271_v13 }
  0x1e   :  { %162 = vmatpush.bf16.msra.mxu0 %v262_v17 }
  0x1f   :  { %175 = vmatpush.bf16.msra.mxu1 %v270_v18 }
  0x21   :  { %163 = vmatmul.bf16.vlgmr.msra.gmra.mxu0 %v55_v19 }
  0x22   :  { %176 = vmatmul.bf16.vlgmr.msra.gmra.mxu1 %v56_v20 }
  0x9e   :  { %v164_v22 = vpop.f32.mrf.mxu0 }
  0x9f   :  { %v177_v23 = vpop.f32.mrf.mxu1  ;;  %v165_v24 = vadd.f32 %v279_v21, %v164_v22 }
  0xa1   :  { %v178_v25 = vadd.f32 %v177_v23, %v165_v24 }
  0xa3   :  { %181 = vst [vmem:[#allocation2] sm:$0xff] %v178_v25 }
  0xa4   :  { %192 = dma.vmem_to_hbm [thread:$0]  %s188_s21, 128, %s190_s24, [#allocation3]  }
  0xa6   :  { %v166_v26 = vpop.f32.mrf.mxu0 }
  0xa7   :  { %v179_v27 = vpop.f32.mrf.mxu1 }
  0xa8   :  { %304 = dma.done.wait [#allocation3], 128  }
  0xa9   :  { %305 = vsyncadd [#allocation3], 4294967168 }
  0xaa   :  { %197 = vsyncpa [#allocation3], 1 }

</bundles_post_ra>
